<compile_context>
chip_gen: v7x
topology: tpu7x:2x2x1
jax: 0.10.0
libtpu: 0.0.40
codegen_flags: <defaults>
</compile_context>

<pallas_src>
import functools

import jax
import jax.numpy as jnp
from jax.experimental import pallas as pl
from jax.experimental.pallas import tpu as pltpu

IN_FEATURES = 32 * 32 * 3   # 3072, same as torch x.view(B, -1)
HIDDEN = 128
OUT_PAD = 128               # lane-dense classifier width (>= num_classes)


def mlp_kernel(x_ref, w1_ref, b1_ref, w2_ref, b2_ref,
               w3_ref, b3_ref, wc_ref, bc_ref, o_ref):
    # x arrives as f32; cast to bf16 in-kernel (hidden under the x DMA).
    x = x_ref[...].astype(jnp.bfloat16)
    # fc1 + relu : bf16 operands, f32 accumulation on the MXU
    h = jnp.dot(x, w1_ref[...], preferred_element_type=jnp.float32)
    h = jnp.maximum(h + b1_ref[...], 0.0).astype(jnp.bfloat16)
    # fc2 + relu
    h = jnp.dot(h, w2_ref[...], preferred_element_type=jnp.float32)
    h = jnp.maximum(h + b2_ref[...], 0.0).astype(jnp.bfloat16)
    # fc3 + relu
    h = jnp.dot(h, w3_ref[...], preferred_element_type=jnp.float32)
    h = jnp.maximum(h + b3_ref[...], 0.0).astype(jnp.bfloat16)
    # classifier (padded to 128 lanes -> unmasked stores), no activation
    o = jnp.dot(h, wc_ref[...], preferred_element_type=jnp.float32) + bc_ref[...]
    o_ref[...] = o.astype(o_ref.dtype)


def _round_up(x, m):
    return (x + m - 1) // m * m


@functools.lru_cache(maxsize=None)
def _vmem_capacity_bytes():
    try:
        return int(pltpu.get_tpu_info().vmem_capacity_bytes)
    except Exception:
        return 64 << 20          # conservative (v7x per-TensorCore VMEM)


def _pick_batch_tile(batch):
    """Batch tile sized per generation's VMEM; multiple of 16 (bf16 sublane)."""
    tb_max = 2048 if _vmem_capacity_bytes() >= (100 << 20) else 1024
    if batch <= 256:
        return max(16, _round_up(batch, 16))       # single small tile
    # >= 2 tiles so v7x's "parallel" batch axis shards over both TensorCores;
    # a second tile is harmless on single-TC v5e/v6e and enables pipelining.
    return max(16, min(tb_max, _round_up(pl.cdiv(batch, 2), 16)))


def prepare_params(params, num_classes=10):
    """One-time param prep (do NOT call per forward step):
    bf16 weights (MXU-native, half HBM bytes), f32 biases as (1, N) rows,
    classifier weight/bias zero-padded to a lane-dense 128-wide block."""
    w1, b1, w2, b2, w3, b3, wc, bc = params
    wcb = jnp.zeros((HIDDEN, OUT_PAD), jnp.bfloat16)
    wcb = wcb.at[:, :num_classes].set(wc.astype(jnp.bfloat16))
    bcb = jnp.zeros((1, OUT_PAD), jnp.float32)
    bcb = bcb.at[:, :num_classes].set(bc.reshape(1, -1).astype(jnp.float32))
    return (w1.astype(jnp.bfloat16), b1.reshape(1, -1).astype(jnp.float32),
            w2.astype(jnp.bfloat16), b2.reshape(1, -1).astype(jnp.float32),
            w3.astype(jnp.bfloat16), b3.reshape(1, -1).astype(jnp.float32),
            wcb, bcb)


@functools.partial(jax.jit, static_argnames=("num_classes",))
def mlp_forward(x_nchw, prepared_params, num_classes=10):
    """x_nchw: (B, 3, 32, 32) float32.  Returns logits (B, num_classes)."""
    w1b, b1, w2b, b2, w3b, b3, wcb, bcb = prepared_params
    B = x_nchw.shape[0]
    x_flat = x_nchw.reshape(B, -1)               # f32 view, no cast, no copy

    TB = _pick_batch_tile(B)
    if B < TB:                                    # single-tile path: tiny pad
        x_flat = jnp.pad(x_flat, ((0, TB - B), (0, 0)))
    rows = x_flat.shape[0]
    num_tiles = pl.cdiv(rows, TB)                 # remainder tile masked by Pallas

    # Weights / biases: constant index_map -> VMEM-resident, DMA'd once.
    resident = lambda shape: pl.BlockSpec(shape, lambda i: (0, 0))

    x_tile_bytes = TB * IN_FEATURES * 4           # f32 x tile
    out_tile_bytes = TB * OUT_PAD * 4
    vmem_limit = min(
        2 * (x_tile_bytes + out_tile_bytes)       # double-buffered x / out
        + x_tile_bytes // 2                       # in-kernel bf16 copy of x tile
        + (16 << 20),                             # weights + temporaries + slack
        _vmem_capacity_bytes() - (8 << 20),
    )

    flops = 2 * rows * (IN_FEATURES * HIDDEN
                        + 2 * HIDDEN * HIDDEN
                        + HIDDEN * OUT_PAD)
    bytes_accessed = (rows * IN_FEATURES * 4                               # x (f32)
                      + (w1b.size + w2b.size + w3b.size + wcb.size) * 2    # bf16 w
                      + (b1.size + b2.size + b3.size + bcb.size) * 4       # f32 b
                      + rows * OUT_PAD * 4)                                # output

    out = pl.pallas_call(
        mlp_kernel,
        grid=(num_tiles,),
        out_shape=jax.ShapeDtypeStruct((rows, OUT_PAD), jnp.float32),
        in_specs=[
            pl.BlockSpec((TB, IN_FEATURES), lambda i: (i, 0)),   # f32 x tile
            resident(w1b.shape), resident(b1.shape),
            resident(w2b.shape), resident(b2.shape),
            resident(w3b.shape), resident(b3.shape),
            resident(wcb.shape), resident(bcb.shape),
        ],
        out_specs=pl.BlockSpec((TB, OUT_PAD), lambda i: (i, 0)),
        compiler_params=pltpu.CompilerParams(
            dimension_semantics=("parallel",),      # shard batch tiles over TCs
            vmem_limit_bytes=int(vmem_limit),
        ),
        cost_estimate=pl.CostEstimate(
            flops=flops, transcendentals=0, bytes_accessed=int(bytes_accessed)),
    )(x_flat, w1b, b1, w2b, b2, w3b, b3, wcb, bcb)

    # Padded columns (num_classes..127) are zero logits; never expose them.
    return out[:B, :num_classes]


def init_params(key, num_classes=10):
    """Deterministic parameter init matching the module's shapes.
    Linear weights stored as (in_features, out_features) so the kernel
    computes x @ W + b."""
    dims = [(IN_FEATURES, HIDDEN), (HIDDEN, HIDDEN),
            (HIDDEN, HIDDEN), (HIDDEN, num_classes)]
    params = []
    for fan_in, fan_out in dims:
        key, kw, kb = jax.random.split(key, 3)
        bound = 1.0 / (fan_in ** 0.5)   # torch.nn.Linear default scale
        w = jax.random.uniform(kw, (fan_in, fan_out), jnp.float32, -bound, bound)
        b = jax.random.uniform(kb, (1, fan_out), jnp.float32, -bound, bound)
        params += [w, b]
    return tuple(params)


if __name__ == "__main__":
    key = jax.random.PRNGKey(0)
    key, kx = jax.random.split(key)

    batch = 2
    num_classes = 10
    x = jax.random.normal(kx, (batch, 3, 32, 32), dtype=jnp.float32)
    params = init_params(key, num_classes=num_classes)
    prepared = prepare_params(params, num_classes=num_classes)   # one-time prep

    out = mlp_forward(x, prepared, num_classes=num_classes)
    out = jax.block_until_ready(out)

    # sanity: plain-JAX reference with the same bf16 operands / f32 accumulate
    w1, b1, w2, b2, w3, b3, wc, bc = params
    h = x.reshape(batch, -1).astype(jnp.bfloat16)
    h = jnp.maximum(jnp.dot(h, w1.astype(jnp.bfloat16),
                            preferred_element_type=jnp.float32) + b1, 0.0)
    h = jnp.maximum(jnp.dot(h.astype(jnp.bfloat16), w2.astype(jnp.bfloat16),
                            preferred_element_type=jnp.float32) + b2, 0.0)
    h = jnp.maximum(jnp.dot(h.astype(jnp.bfloat16), w3.astype(jnp.bfloat16),
                            preferred_element_type=jnp.float32) + b3, 0.0)
    ref = jnp.dot(h.astype(jnp.bfloat16), wc.astype(jnp.bfloat16),
                  preferred_element_type=jnp.float32) + bc

    assert out.shape == (batch, num_classes)
    assert jnp.allclose(out, ref, atol=1e-2, rtol=1e-2)

    print("KERNEL_OK")
</pallas_src>

<mosaic_0001>
module attributes {stable_mosaic.version = 11 : i64} {
  func.func @mlp_kernel(%arg0: i32, %arg1: memref<16x3072xf32, #tpu.memory_space<vmem>>, %arg2: memref<3072x128xbf16, #tpu.memory_space<vmem>>, %arg3: memref<1x128xf32, #tpu.memory_space<vmem>>, %arg4: memref<128x128xbf16, #tpu.memory_space<vmem>>, %arg5: memref<1x128xf32, #tpu.memory_space<vmem>>, %arg6: memref<128x128xbf16, #tpu.memory_space<vmem>>, %arg7: memref<1x128xf32, #tpu.memory_space<vmem>>, %arg8: memref<128x128xbf16, #tpu.memory_space<vmem>>, %arg9: memref<1x128xf32, #tpu.memory_space<vmem>>, %arg10: memref<16x128xf32, #tpu.memory_space<vmem>>) attributes {dimension_semantics = [#tpu.dimension_semantics<parallel>], iteration_bounds = array<i64: 1>, scalar_prefetch = 0 : i64, scratch_operands = 0 : i64, tpu.core_type = #tpu.core_type<tc>, window_params = [{transform_indices = @transform_0, window_bounds = array<i64: 16, 3072>}, {pipeline_mode = #tpu.pipeline_mode<synchronous>, transform_indices = @transform_1, window_bounds = array<i64: 3072, 128>}, {pipeline_mode = #tpu.pipeline_mode<synchronous>, transform_indices = @transform_2, window_bounds = array<i64: 1, 128>}, {pipeline_mode = #tpu.pipeline_mode<synchronous>, transform_indices = @transform_3, window_bounds = array<i64: 128, 128>}, {pipeline_mode = #tpu.pipeline_mode<synchronous>, transform_indices = @transform_4, window_bounds = array<i64: 1, 128>}, {pipeline_mode = #tpu.pipeline_mode<synchronous>, transform_indices = @transform_5, window_bounds = array<i64: 128, 128>}, {pipeline_mode = #tpu.pipeline_mode<synchronous>, transform_indices = @transform_6, window_bounds = array<i64: 1, 128>}, {pipeline_mode = #tpu.pipeline_mode<synchronous>, transform_indices = @transform_7, window_bounds = array<i64: 128, 128>}, {pipeline_mode = #tpu.pipeline_mode<synchronous>, transform_indices = @transform_8, window_bounds = array<i64: 1, 128>}, {transform_indices = @transform_9, window_bounds = array<i64: 16, 128>}]} {
    %c0 = arith.constant 0 : index
    %c0_0 = arith.constant 0 : index
    %0 = vector.load %arg1[%c0, %c0_0] : memref<16x3072xf32, #tpu.memory_space<vmem>>, vector<16x3072xf32>
    %1 = arith.truncf %0 : vector<16x3072xf32> to vector<16x3072xbf16>
    %c0_1 = arith.constant 0 : index
    %c0_2 = arith.constant 0 : index
    %2 = vector.load %arg2[%c0_1, %c0_2] : memref<3072x128xbf16, #tpu.memory_space<vmem>>, vector<3072x128xbf16>
    %cst = arith.constant dense<0.000000e+00> : vector<16x128xf32>
    %3 = tpu.matmul %1, %2, %cst {dimension_numbers = #tpu.dot_dimension_numbers<[1], [0], [0], [1], [0, 0, 1, 1], [], []>} : vector<16x3072xbf16>, vector<3072x128xbf16>, vector<16x128xf32> -> vector<16x128xf32>
    %c0_3 = arith.constant 0 : index
    %c0_4 = arith.constant 0 : index
    %4 = vector.load %arg3[%c0_3, %c0_4] : memref<1x128xf32, #tpu.memory_space<vmem>>, vector<1x128xf32>
    %5 = vector.broadcast %4 : vector<1x128xf32> to vector<16x128xf32>
    %6 = arith.addf %3, %5 : vector<16x128xf32>
    %cst_5 = arith.constant 0.000000e+00 : f32
    %7 = vector.broadcast %cst_5 : f32 to vector<16x128xf32>
    %8 = arith.maximumf %6, %7 : vector<16x128xf32>
    %9 = arith.truncf %8 : vector<16x128xf32> to vector<16x128xbf16>
    %c0_6 = arith.constant 0 : index
    %c0_7 = arith.constant 0 : index
    %10 = vector.load %arg4[%c0_6, %c0_7] : memref<128x128xbf16, #tpu.memory_space<vmem>>, vector<128x128xbf16>
    %cst_8 = arith.constant dense<0.000000e+00> : vector<16x128xf32>
    %11 = tpu.matmul %9, %10, %cst_8 {dimension_numbers = #tpu.dot_dimension_numbers<[1], [0], [0], [1], [0, 0, 1, 1], [], []>} : vector<16x128xbf16>, vector<128x128xbf16>, vector<16x128xf32> -> vector<16x128xf32>
    %c0_9 = arith.constant 0 : index
    %c0_10 = arith.constant 0 : index
    %12 = vector.load %arg5[%c0_9, %c0_10] : memref<1x128xf32, #tpu.memory_space<vmem>>, vector<1x128xf32>
    %13 = vector.broadcast %12 : vector<1x128xf32> to vector<16x128xf32>
    %14 = arith.addf %11, %13 : vector<16x128xf32>
    %cst_11 = arith.constant 0.000000e+00 : f32
    %15 = vector.broadcast %cst_11 : f32 to vector<16x128xf32>
    %16 = arith.maximumf %14, %15 : vector<16x128xf32>
    %17 = arith.truncf %16 : vector<16x128xf32> to vector<16x128xbf16>
    %c0_12 = arith.constant 0 : index
    %c0_13 = arith.constant 0 : index
    %18 = vector.load %arg6[%c0_12, %c0_13] : memref<128x128xbf16, #tpu.memory_space<vmem>>, vector<128x128xbf16>
    %cst_14 = arith.constant dense<0.000000e+00> : vector<16x128xf32>
    %19 = tpu.matmul %17, %18, %cst_14 {dimension_numbers = #tpu.dot_dimension_numbers<[1], [0], [0], [1], [0, 0, 1, 1], [], []>} : vector<16x128xbf16>, vector<128x128xbf16>, vector<16x128xf32> -> vector<16x128xf32>
    %c0_15 = arith.constant 0 : index
    %c0_16 = arith.constant 0 : index
    %20 = vector.load %arg7[%c0_15, %c0_16] : memref<1x128xf32, #tpu.memory_space<vmem>>, vector<1x128xf32>
    %21 = vector.broadcast %20 : vector<1x128xf32> to vector<16x128xf32>
    %22 = arith.addf %19, %21 : vector<16x128xf32>
    %cst_17 = arith.constant 0.000000e+00 : f32
    %23 = vector.broadcast %cst_17 : f32 to vector<16x128xf32>
    %24 = arith.maximumf %22, %23 : vector<16x128xf32>
    %25 = arith.truncf %24 : vector<16x128xf32> to vector<16x128xbf16>
    %c0_18 = arith.constant 0 : index
    %c0_19 = arith.constant 0 : index
    %26 = vector.load %arg8[%c0_18, %c0_19] : memref<128x128xbf16, #tpu.memory_space<vmem>>, vector<128x128xbf16>
    %cst_20 = arith.constant dense<0.000000e+00> : vector<16x128xf32>
    %27 = tpu.matmul %25, %26, %cst_20 {dimension_numbers = #tpu.dot_dimension_numbers<[1], [0], [0], [1], [0, 0, 1, 1], [], []>} : vector<16x128xbf16>, vector<128x128xbf16>, vector<16x128xf32> -> vector<16x128xf32>
    %c0_21 = arith.constant 0 : index
    %c0_22 = arith.constant 0 : index
    %28 = vector.load %arg9[%c0_21, %c0_22] : memref<1x128xf32, #tpu.memory_space<vmem>>, vector<1x128xf32>
    %29 = vector.broadcast %28 : vector<1x128xf32> to vector<16x128xf32>
    %30 = arith.addf %27, %29 : vector<16x128xf32>
    %c0_23 = arith.constant 0 : index
    %c0_24 = arith.constant 0 : index
    %31 = vector.load %arg10[%c0_23, %c0_24] : memref<16x128xf32, #tpu.memory_space<vmem>>, vector<16x128xf32>
    tpu.vector_store %arg10[%c0_23, %c0_24], %30 {strides = array<i32>} : memref<16x128xf32, #tpu.memory_space<vmem>>, vector<16x128xf32>,
    return
  }
  func.func @transform_0(%arg0: i32) -> (i32, i32) {
    %c0_i32 = arith.constant 0 : i32
    %c0_i32_0 = arith.constant 0 : i32
    return %arg0, %c0_i32 : i32, i32
  }
  func.func @transform_1(%arg0: i32) -> (i32, i32) {
    %c0_i32 = arith.constant 0 : i32
    %c0_i32_0 = arith.constant 0 : i32
    %c0_i32_1 = arith.constant 0 : i32
    return %c0_i32, %c0_i32_0 : i32, i32
  }
  func.func @transform_2(%arg0: i32) -> (i32, i32) {
    %c0_i32 = arith.constant 0 : i32
    %c0_i32_0 = arith.constant 0 : i32
    %c0_i32_1 = arith.constant 0 : i32
    return %c0_i32, %c0_i32_0 : i32, i32
  }
  func.func @transform_3(%arg0: i32) -> (i32, i32) {
    %c0_i32 = arith.constant 0 : i32
    %c0_i32_0 = arith.constant 0 : i32
    %c0_i32_1 = arith.constant 0 : i32
    return %c0_i32, %c0_i32_0 : i32, i32
  }
  func.func @transform_4(%arg0: i32) -> (i32, i32) {
    %c0_i32 = arith.constant 0 : i32
    %c0_i32_0 = arith.constant 0 : i32
    %c0_i32_1 = arith.constant 0 : i32
    return %c0_i32, %c0_i32_0 : i32, i32
  }
  func.func @transform_5(%arg0: i32) -> (i32, i32) {
    %c0_i32 = arith.constant 0 : i32
    %c0_i32_0 = arith.constant 0 : i32
    %c0_i32_1 = arith.constant 0 : i32
    return %c0_i32, %c0_i32_0 : i32, i32
  }
  func.func @transform_6(%arg0: i32) -> (i32, i32) {
    %c0_i32 = arith.constant 0 : i32
    %c0_i32_0 = arith.constant 0 : i32
    %c0_i32_1 = arith.constant 0 : i32
    return %c0_i32, %c0_i32_0 : i32, i32
  }
  func.func @transform_7(%arg0: i32) -> (i32, i32) {
    %c0_i32 = arith.constant 0 : i32
    %c0_i32_0 = arith.constant 0 : i32
    %c0_i32_1 = arith.constant 0 : i32
    return %c0_i32, %c0_i32_0 : i32, i32
  }
  func.func @transform_8(%arg0: i32) -> (i32, i32) {
    %c0_i32 = arith.constant 0 : i32
    %c0_i32_0 = arith.constant 0 : i32
    %c0_i32_1 = arith.constant 0 : i32
    return %c0_i32, %c0_i32_0 : i32, i32
  }
  func.func @transform_9(%arg0: i32) -> (i32, i32) {
    %c0_i32 = arith.constant 0 : i32
    %c0_i32_0 = arith.constant 0 : i32
    return %arg0, %c0_i32 : i32, i32
  }
}

</mosaic_0001>

<bundles_post_ra>
// kernel: mlp_forward.1
= control target key start
LH: loop header
LB: loop body
LE: loop exit
PB: predicated region body
PF: predicated region fallthrough
CT: control target
= control target key end

     0   :  { %14 = vsyncpa [#allocation3], 0  ;;  %s3322_s30 = smov [#allocation2]   ;;  %s3653_s0 = inlined_call_operand.vmem [shape: f32[16,3072], index: 0, kind: input, shape index: {}]   ;;  %s3654_s1 = inlined_call_operand.hbm [shape: bf16[3072,128], index: 1, kind: input, shape index: {}]   ;;  %s3655_s2 = inlined_call_operand.vmem [shape: f32[1,128], index: 2, kind: input, shape index: {}]   ;;  %s3656_s3 = inlined_call_operand.vmem [shape: bf16[128,128], index: 3, kind: input, shape index: {}]   ;;  %s3657_s4 = inlined_call_operand.vmem [shape: f32[1,128], index: 4, kind: input, shape index: {}]   ;;  %s3658_s5 = inlined_call_operand.vmem [shape: bf16[128,128], index: 5, kind: input, shape index: {}]   ;;  %s3659_s6 = inlined_call_operand.vmem [shape: f32[1,128], index: 6, kind: input, shape index: {}]   ;;  %s3660_s7 = inlined_call_operand.vmem [shape: bf16[128,128], index: 7, kind: input, shape index: {}]   ;;  %s3661_s8 = inlined_call_operand.vmem [shape: f32[1,128], index: 8, kind: input, shape index: {}]   ;;  %s3662_s9 = inlined_call_operand.vmem [shape: f32[16,128], index: 9, kind: output, shape index: {}]  }
   0x1   :  { %s22_s10 = sshll.u32 %s3322_s30, 4  ;;  %s3298_s13 = scalar_lea.hbm %s3654_s1, 24576  ;;  %s23_s10 = int_to_ptr.vmem [resolvable:$true] %s22_s10 }
   0x2   :  { %p3299_p0 = scmp.ne.s32.totalorder %s3654_s1, %s3298_s13  ;;  %p3302_p1 = scmp.lt.u32.totalorder %s3298_s13, %s3654_s1 }
   0x4   :  { %p3304_p2 = pnand %p3302_p1, %p3299_p0 }
   0x6   :  { %3307 = shalt.err (!%p3304_p2)
}
   0x7   :  { %s3308_s18 = scalar_lea.vmem %s23_s10, 24576  ;;  %p3313_p4 = scmp.lt.s32.totalorder %s23_s10, %s23_s10 }
   0x8   :  { %p3309_p3 = scmp.ne.s32.totalorder %s23_s10, %s3308_s18  ;;  %p3314_p5 = scmp.lt.s32.totalorder %s3308_s18, %s3308_s18 }
   0xa   :  { %p3315_p6 = por %p3314_p5, %p3313_p4 }
   0xc   :  { %p3316_p7 = pnand %p3315_p6, %p3309_p3 }
   0xe   :  { %3319 = shalt.err (!%p3316_p7)
}
   0xf   :  { %s3323_s19 = smov 64   ;;  %s3324_s20 = smov 4  }
  0x10   :  { %28 = dma.hbm_to_vmem [thread:$0]  %s3654_s1, 24576, %s23_s10, [#allocation3], %s3323_s19, %s3323_s19, %s3324_s20  }
  0x11   :  { %3320 = dma.done.wait [#allocation3], 24576  }
  0x12   :  { %3321 = vsyncadd [#allocation3], 4294942720  ;;  %v3082_v0 = vld [vmem:[#allocation2 + $0x40] sm:$0xff]   ;;  %v3086_v4 = vld [vmem:[#allocation2 + $0x48] sm:$0xff]   ;;  %vm3326_vm0 = vmmov 0  }
  0x13   :  { %v3083_v1 = vld [vmem:[#allocation2 + $0xc0] sm:$0xff]   ;;  %2726 = vmatprep.subr.bf16.mxu0 %v3082_v0  ;;  %v3087_v5 = vld [vmem:[#allocation2 + $0xc8] sm:$0xff]   ;;  %v3090_v8 = vld [vmem:[#allocation2 + $0x50] sm:$0xff]  }
  0x14   :  { %v3084_v2 = vld [vmem:[#allocation2] sm:$0xff]   ;;  %2748 = vmatprep.subr.bf16.mxu1 %v3083_v1  ;;  %v3088_v6 = vld [vmem:[#allocation2 + $0x8] sm:$0xff]   ;;  %v3091_v9 = vld [vmem:[#allocation2 + $0xd0] sm:$0xff]  }
  0x15   :  { %v3085_v3 = vld [vmem:[#allocation2 + $0x80] sm:$0xff]   ;;  %2727 = vmatpush3.bf16.msra.mxu0 %v3084_v2  ;;  %v3089_v7 = vld [vmem:[#allocation2 + $0x88] sm:$0xff]   ;;  %v3092_v10 = vld [vmem:[#allocation2 + $0x10] sm:$0xff]  }
  0x16   :  { %2749 = vmatpush3.bf16.msra.mxu1 %v3085_v3  ;;  %2728 = vmatprep.subr.bf16.mxu0 %v3086_v4  ;;  %v3093_v11 = vld [vmem:[#allocation2 + $0x90] sm:$0xff]   ;;  %v3094_v12 = vld [vmem:[#allocation2 + $0x58] sm:$0xff]   ;;  %v3098_v16 = vld [vmem:[#allocation2 + $0x60] sm:$0xff]  }
  0x17   :  { %2750 = vmatprep.subr.bf16.mxu1 %v3087_v5  ;;  %v3095_v13 = vld [vmem:[#allocation2 + $0xd8] sm:$0xff]   ;;  %v3099_v17 = vld [vmem:[#allocation2 + $0xe0] sm:$0xff]   ;;  %v3102_v20 = vld [vmem:[#allocation2 + $0x68] sm:$0xff]  }
  0x18   :  { %v3096_v14 = vld [vmem:[#allocation2 + $0x18] sm:$0xff]   ;;  %v3100_v18 = vld [vmem:[#allocation2 + $0x20] sm:$0xff]   ;;  %v3103_v21 = vld [vmem:[#allocation2 + $0xe8] sm:$0xff]  }
  0x19   :  { %2729 = vmatpush3.bf16.msra.mxu0 %v3088_v6  ;;  %v3097_v15 = vld [vmem:[#allocation2 + $0x98] sm:$0xff]   ;;  %v3101_v19 = vld [vmem:[#allocation2 + $0xa0] sm:$0xff]   ;;  %v3104_v22 = vld [vmem:[#allocation2 + $0x28] sm:$0xff]  }
  0x1a   :  { %2751 = vmatpush3.bf16.msra.mxu1 %v3089_v7  ;;  %2730 = vmatprep.subr.bf16.mxu0 %v3090_v8  ;;  %v3105_v23 = vld [vmem:[#allocation2 + $0xa8] sm:$0xff]   ;;  %v3106_v24 = vld [vmem:[#allocation2 + $0x70] sm:$0xff]   ;;  %v3110_v28 = vld [vmem:[#allocation2 + $0x78] sm:$0xff]  }
  0x1b   :  { %2752 = vmatprep.subr.bf16.mxu1 %v3091_v9  ;;  %v3107_v25 = vld [vmem:[#allocation2 + $0xf0] sm:$0xff]   ;;  %v3111_v29 = vld [vmem:[#allocation2 + $0xf8] sm:$0xff]   ;;  %v48_v32 = vld [vmem:[%s3653_s0 + $0x8] sm:$0xff] }
  0x1c   :  { %v3108_v26 = vld [vmem:[#allocation2 + $0x30] sm:$0xff]   ;;  %v3112_v30 = vld [vmem:[#allocation2 + $0x38] sm:$0xff]   ;;  %v72_v33 = vld [vmem:[%s3653_s0 + $0xc8] sm:$0xff] }
  0x1d   :  { %2731 = vmatpush3.bf16.msra.mxu0 %v3092_v10  ;;  %v3109_v27 = vld [vmem:[#allocation2 + $0xb0] sm:$0xff]   ;;  %v3113_v31 = vld [vmem:[#allocation2 + $0xb8] sm:$0xff]   ;;  %v96_v35 = vpack.c.bf16 %v72_v33, %v48_v32  ;;  %v47_v37 = vld [vmem:[%s3653_s0] sm:$0xff] }
  0x1e   :  { %2753 = vmatpush3.bf16.msra.mxu1 %v3093_v11  ;;  %2732 = vmatprep.subr.bf16.mxu0 %v3094_v12  ;;  %v50_v34 = vld [vmem:[%s3653_s0 + $0x18] sm:$0xff]  ;;  %v71_v38 = vld [vmem:[%s3653_s0 + $0xc0] sm:$0xff]  ;;  %v49_v41 = vld [vmem:[%s3653_s0 + $0x10] sm:$0xff] }
  0x1f   :  { %2754 = vmatprep.subr.bf16.mxu1 %v3095_v13  ;;  %v74_v36 = vld [vmem:[%s3653_s0 + $0xd8] sm:$0xff]  ;;  %v95_v40 = vpack.c.bf16 %v71_v38, %v47_v37  ;;  %v73_v42 = vld [vmem:[%s3653_s0 + $0xd0] sm:$0xff]  ;;  %1694 = vmatprep.mubr.bf16.mxu0 %v96_v35  ;;  %v3114_v44 = vld [vmem:[#allocation2 + $0x140] sm:$0xff]  }
  0x20   :  { %v98_v39 = vpack.c.bf16 %v74_v36, %v50_v34  ;;  %v97_v43 = vpack.c.bf16 %v73_v42, %v49_v41  ;;  %v3115_v45 = vld [vmem:[#allocation2 + $0x1c0] sm:$0xff]   ;;  %v3118_v48 = vld [vmem:[#allocation2 + $0x148] sm:$0xff]   ;;  %v3122_v52 = vld [vmem:[#allocation2 + $0x150] sm:$0xff]  }
  0x21   :  { %2733 = vmatpush3.bf16.msra.mxu0 %v3096_v14  ;;  %v3116_v46 = vld [vmem:[#allocation2 + $0x100] sm:$0xff]   ;;  %v3119_v49 = vld [vmem:[#allocation2 + $0x1c8] sm:$0xff]   ;;  %v3123_v53 = vld [vmem:[#allocation2 + $0x1d0] sm:$0xff]  }
  0x22   :  { %2755 = vmatpush3.bf16.msra.mxu1 %v3097_v15  ;;  %2734 = vmatprep.subr.bf16.mxu0 %v3098_v16  ;;  %v3117_v47 = vld [vmem:[#allocation2 + $0x180] sm:$0xff]   ;;  %v3120_v50 = vld [vmem:[#allocation2 + $0x108] sm:$0xff]   ;;  %v3124_v54 = vld [vmem:[#allocation2 + $0x110] sm:$0xff]  }
  0x23   :  { %2756 = vmatprep.subr.bf16.mxu1 %v3099_v17  ;;  %1735 = vmatprep.mubr.bf16.mxu1 %v98_v39  ;;  %v3121_v51 = vld [vmem:[#allocation2 + $0x188] sm:$0xff]   ;;  %v3125_v55 = vld [vmem:[#allocation2 + $0x190] sm:$0xff]   ;;  %v3126_v56 = vld [vmem:[#allocation2 + $0x158] sm:$0xff]  }
  0x24   :  { %v3127_v57 = vld [vmem:[#allocation2 + $0x1d8] sm:$0xff]   ;;  %v3130_v60 = vld [vmem:[#allocation2 + $0x160] sm:$0xff]   ;;  %v3134_v0 = vld [vmem:[#allocation2 + $0x168] sm:$0xff]  }
  0x25   :  { %2735 = vmatpush3.bf16.msra.mxu0 %v3100_v18  ;;  %v3128_v58 = vld [vmem:[#allocation2 + $0x118] sm:$0xff]   ;;  %v3131_v61 = vld [vmem:[#allocation2 + $0x1e0] sm:$0xff]   ;;  %v3135_v1 = vld [vmem:[#allocation2 + $0x1e8] sm:$0xff]  }
  0x26   :  { %2757 = vmatpush3.bf16.msra.mxu1 %v3101_v19  ;;  %2736 = vmatprep.subr.bf16.mxu0 %v3102_v20  ;;  %v3129_v59 = vld [vmem:[#allocation2 + $0x198] sm:$0xff]   ;;  %v3132_v62 = vld [vmem:[#allocation2 + $0x120] sm:$0xff]   ;;  %v3136_v2 = vld [vmem:[#allocation2 + $0x128] sm:$0xff]  }
  0x27   :  { %2758 = vmatprep.subr.bf16.mxu1 %v3103_v21  ;;  %v3133_v63 = vld [vmem:[#allocation2 + $0x1a0] sm:$0xff]   ;;  %v3137_v3 = vld [vmem:[#allocation2 + $0x1a8] sm:$0xff]   ;;  %v3138_v4 = vld [vmem:[#allocation2 + $0x170] sm:$0xff]  }
  0x28   :  { %v3139_v5 = vld [vmem:[#allocation2 + $0x1f0] sm:$0xff]   ;;  %v3142_v8 = vld [vmem:[#allocation2 + $0x178] sm:$0xff]   ;;  %v52_v12 = vld [vmem:[%s3653_s0 + $0x28] sm:$0xff] }
  0x29   :  { %2737 = vmatpush3.bf16.msra.mxu0 %v3104_v22  ;;  %v3140_v6 = vld [vmem:[#allocation2 + $0x130] sm:$0xff]   ;;  %v3143_v9 = vld [vmem:[#allocation2 + $0x1f8] sm:$0xff]   ;;  %v76_v13 = vld [vmem:[%s3653_s0 + $0xe8] sm:$0xff] }
  0x2a   :  { %2759 = vmatpush3.bf16.msra.mxu1 %v3105_v23  ;;  %2738 = vmatprep.subr.bf16.mxu0 %v3106_v24  ;;  %v3141_v7 = vld [vmem:[#allocation2 + $0x1b0] sm:$0xff]   ;;  %v3144_v10 = vld [vmem:[#allocation2 + $0x138] sm:$0xff]   ;;  %v100_v16 = vpack.c.bf16 %v76_v13, %v52_v12  ;;  %v51_v18 = vld [vmem:[%s3653_s0 + $0x20] sm:$0xff] }
  0x2b   :  { %2760 = vmatprep.subr.bf16.mxu1 %v3107_v25  ;;  %v3145_v11 = vld [vmem:[#allocation2 + $0x1b8] sm:$0xff]   ;;  %v75_v19 = vld [vmem:[%s3653_s0 + $0xe0] sm:$0xff]  ;;  %v53_v20 = vld [vmem:[%s3653_s0 + $0x30] sm:$0xff] }
  0x2c   :  { %v54_v14 = vld [vmem:[%s3653_s0 + $0x38] sm:$0xff]  ;;  %v99_v21 = vpack.c.bf16 %v75_v19, %v51_v18  ;;  %v77_v22 = vld [vmem:[%s3653_s0 + $0xf0] sm:$0xff]  ;;  %v3146_v24 = vld [vmem:[#allocation2 + $0x240] sm:$0xff]  }
  0x2d   :  { %2739 = vmatpush3.bf16.msra.mxu0 %v3108_v26  ;;  %v78_v15 = vld [vmem:[%s3653_s0 + $0xf8] sm:$0xff]  ;;  %v101_v23 = vpack.c.bf16 %v77_v22, %v53_v20  ;;  %v3147_v25 = vld [vmem:[#allocation2 + $0x2c0] sm:$0xff]   ;;  %v3154_v32 = vld [vmem:[#allocation2 + $0x250] sm:$0xff]  }
  0x2e   :  { %2761 = vmatpush3.bf16.msra.mxu1 %v3109_v27  ;;  %2740 = vmatprep.subr.bf16.mxu0 %v3110_v28  ;;  %v102_v17 = vpack.c.bf16 %v78_v15, %v54_v14  ;;  %v3148_v26 = vld [vmem:[#allocation2 + $0x200] sm:$0xff]   ;;  %v3150_v28 = vld [vmem:[#allocation2 + $0x248] sm:$0xff]   ;;  %v3155_v33 = vld [vmem:[#allocation2 + $0x2d0] sm:$0xff]  }
  0x2f   :  { %2762 = vmatprep.subr.bf16.mxu1 %v3111_v29  ;;  %v3149_v27 = vld [vmem:[#allocation2 + $0x280] sm:$0xff]   ;;  %v3151_v29 = vld [vmem:[#allocation2 + $0x2c8] sm:$0xff]   ;;  %v3156_v34 = vld [vmem:[#allocation2 + $0x210] sm:$0xff]  }
  0x30   :  { %v3157_v35 = vld [vmem:[#allocation2 + $0x290] sm:$0xff]   ;;  %v3158_v36 = vld [vmem:[#allocation2 + $0x258] sm:$0xff]   ;;  %v3163_v41 = vld [vmem:[#allocation2 + $0x2e0] sm:$0xff]  }
  0x31   :  { %2741 = vmatpush3.bf16.msra.mxu0 %v3112_v30  ;;  %v3152_v30 = vld [vmem:[#allocation2 + $0x208] sm:$0xff]   ;;  %v3159_v37 = vld [vmem:[#allocation2 + $0x2d8] sm:$0xff]   ;;  %v3164_v42 = vld [vmem:[#allocation2 + $0x220] sm:$0xff]  }
  0x32   :  { %2763 = vmatpush3.bf16.msra.mxu1 %v3113_v31  ;;  %2770 = vmatprep.subr.bf16.mxu0 %v3114_v44  ;;  %v3153_v31 = vld [vmem:[#allocation2 + $0x288] sm:$0xff]   ;;  %v3160_v38 = vld [vmem:[#allocation2 + $0x218] sm:$0xff]   ;;  %v3186_v12 = vld [vmem:[#allocation2 + $0x350] sm:$0xff]  }
  0x33   :  { %2792 = vmatprep.subr.bf16.mxu1 %v3115_v45  ;;  %v3161_v39 = vld [vmem:[#allocation2 + $0x298] sm:$0xff]   ;;  %v3166_v44 = vld [vmem:[#allocation2 + $0x268] sm:$0xff]   ;;  %v3187_v13 = vld [vmem:[#allocation2 + $0x3d0] sm:$0xff]  }
  0x34   :  { %1695 = vmatmul.mubr.bf16.vlgmr.msra.gmra.mrb[0].mxu0 %v95_v40  ;;  %v3162_v40 = vld [vmem:[#allocation2 + $0x260] sm:$0xff]   ;;  %v3167_v45 = vld [vmem:[#allocation2 + $0x2e8] sm:$0xff]   ;;  %v3188_v14 = vld [vmem:[#allocation2 + $0x310] sm:$0xff]  }
  0x35   :  { %1736 = vmatmul.mubr.bf16.vlgmr.msra.gmra.mrb[0].mxu1 %v97_v43  ;;  %2771 = vmatpush3.bf16.msra.mxu0 %v3116_v46  ;;  %v3165_v43 = vld [vmem:[#allocation2 + $0x2a0] sm:$0xff]   ;;  %v3168_v46 = vld [vmem:[#allocation2 + $0x228] sm:$0xff]   ;;  %v3189_v15 = vld [vmem:[#allocation2 + $0x390] sm:$0xff]  }
  0x36   :  { %2793 = vmatpush3.bf16.msra.mxu1 %v3117_v47  ;;  %2772 = vmatprep.subr.bf16.mxu0 %v3118_v48  ;;  %v3169_v47 = vld [vmem:[#allocation2 + $0x2a8] sm:$0xff]   ;;  %v3170_v48 = vld [vmem:[#allocation2 + $0x270] sm:$0xff]   ;;  %v3192_v18 = vld [vmem:[#allocation2 + $0x318] sm:$0xff]  }
  0x37   :  { %2794 = vmatprep.subr.bf16.mxu1 %v3119_v49  ;;  %1776 = vmatprep.mubr.bf16.mxu0 %v100_v16  ;;  %v3171_v49 = vld [vmem:[#allocation2 + $0x2f0] sm:$0xff]   ;;  %v3190_v16 = vld [vmem:[#allocation2 + $0x358] sm:$0xff]   ;;  %v3194_v20 = vld [vmem:[#allocation2 + $0x360] sm:$0xff]  }
  0x38   :  { %1817 = vmatprep.mubr.bf16.mxu1 %v102_v17  ;;  %v3191_v17 = vld [vmem:[#allocation2 + $0x3d8] sm:$0xff]   ;;  %v3196_v22 = vld [vmem:[#allocation2 + $0x320] sm:$0xff]  }
  0x39   :  { %2773 = vmatpush3.bf16.msra.mxu0 %v3120_v50  ;;  %v3172_v50 = vld [vmem:[#allocation2 + $0x230] sm:$0xff]   ;;  %v3193_v19 = vld [vmem:[#allocation2 + $0x398] sm:$0xff]  }
  0x3a   :  { %2795 = vmatpush3.bf16.msra.mxu1 %v3121_v51  ;;  %2774 = vmatprep.subr.bf16.mxu0 %v3122_v52  ;;  %v3173_v51 = vld [vmem:[#allocation2 + $0x2b0] sm:$0xff]   ;;  %v3174_v52 = vld [vmem:[#allocation2 + $0x278] sm:$0xff]  }
  0x3b   :  { %2796 = vmatprep.subr.bf16.mxu1 %v3123_v53  ;;  %v3175_v53 = vld [vmem:[#allocation2 + $0x2f8] sm:$0xff]  }
  0x3d   :  { %2775 = vmatpush3.bf16.msra.mxu0 %v3124_v54  ;;  %v3176_v54 = vld [vmem:[#allocation2 + $0x238] sm:$0xff]  }
  0x3e   :  { %2797 = vmatpush3.bf16.msra.mxu1 %v3125_v55  ;;  %2776 = vmatprep.subr.bf16.mxu0 %v3126_v56  ;;  %v3177_v55 = vld [vmem:[#allocation2 + $0x2b8] sm:$0xff]   ;;  %v56_v56 = vld [vmem:[%s3653_s0 + $0x48] sm:$0xff] }
  0x3f   :  { %2798 = vmatprep.subr.bf16.mxu1 %v3127_v57  ;;  %v80_v57 = vld [vmem:[%s3653_s0 + $0x108] sm:$0xff] }
  0x41   :  { %2777 = vmatpush3.bf16.msra.mxu0 %v3128_v58  ;;  %v104_v58 = vpack.c.bf16 %v80_v57, %v56_v56  ;;  %v3218_v56 = vld [vmem:[#allocation2 + $0x450] sm:$0xff]  }
  0x42   :  { %2799 = vmatpush3.bf16.msra.mxu1 %v3129_v59  ;;  %2778 = vmatprep.subr.bf16.mxu0 %v3130_v60  ;;  %v58_v59 = vld [vmem:[%s3653_s0 + $0x58] sm:$0xff]  ;;  %v3219_v57 = vld [vmem:[#allocation2 + $0x4d0] sm:$0xff]  }
  0x43   :  { %2800 = vmatprep.subr.bf16.mxu1 %v3131_v61  ;;  %v82_v60 = vld [vmem:[%s3653_s0 + $0x118] sm:$0xff]  ;;  %v55_v61 = vld [vmem:[%s3653_s0 + $0x40] sm:$0xff] }
  0x45   :  { %2779 = vmatpush3.bf16.msra.mxu0 %v3132_v62  ;;  %v106_v62 = vpack.c.bf16 %v82_v60, %v58_v59  ;;  %v3221_v59 = vld [vmem:[#allocation2 + $0x490] sm:$0xff]   ;;  %v3222_v60 = vld [vmem:[#allocation2 + $0x458] sm:$0xff]  }
  0x46   :  { %2801 = vmatpush3.bf16.msra.mxu1 %v3133_v63  ;;  %2780 = vmatprep.subr.bf16.mxu0 %v3134_v0  ;;  %v79_v63 = vld [vmem:[%s3653_s0 + $0x100] sm:$0xff]  ;;  %v57_v0 = vld [vmem:[%s3653_s0 + $0x50] sm:$0xff] }
  0x47   :  { %2802 = vmatprep.subr.bf16.mxu1 %v3135_v1  ;;  %v81_v1 = vld [vmem:[%s3653_s0 + $0x110] sm:$0xff] }
  0x49   :  { %2781 = vmatpush3.bf16.msra.mxu0 %v3136_v2  ;;  %v103_v2 = vpack.c.bf16 %v79_v63, %v55_v61  ;;  %v3223_v61 = vld [vmem:[#allocation2 + $0x4d8] sm:$0xff]  }
  0x4a   :  { %2803 = vmatpush3.bf16.msra.mxu1 %v3137_v3  ;;  %2782 = vmatprep.subr.bf16.mxu0 %v3138_v4  ;;  %v105_v3 = vpack.c.bf16 %v81_v1, %v57_v0  ;;  %v3178_v4 = vld [vmem:[#allocation2 + $0x340] sm:$0xff]   ;;  %v3225_v63 = vld [vmem:[#allocation2 + $0x498] sm:$0xff]  }
  0x4b   :  { %2804 = vmatprep.subr.bf16.mxu1 %v3139_v5  ;;  %v3179_v5 = vld [vmem:[#allocation2 + $0x3c0] sm:$0xff]  }
  0x4c   :  { %v3226_v0 = vld [vmem:[#allocation2 + $0x460] sm:$0xff]  }
  0x4d   :  { %2783 = vmatpush3.bf16.msra.mxu0 %v3140_v6  ;;  %v3180_v6 = vld [vmem:[#allocation2 + $0x300] sm:$0xff]  }
  0x4e   :  { %2805 = vmatpush3.bf16.msra.mxu1 %v3141_v7  ;;  %2784 = vmatprep.subr.bf16.mxu0 %v3142_v8  ;;  %v3181_v7 = vld [vmem:[#allocation2 + $0x380] sm:$0xff]   ;;  %v3182_v8 = vld [vmem:[#allocation2 + $0x348] sm:$0xff]  }
  0x4f   :  { %2806 = vmatprep.subr.bf16.mxu1 %v3143_v9  ;;  %v3183_v9 = vld [vmem:[#allocation2 + $0x3c8] sm:$0xff]   ;;  %v3227_v1 = vld [vmem:[#allocation2 + $0x4e0] sm:$0xff]  }
  0x51   :  { %2785 = vmatpush3.bf16.msra.mxu0 %v3144_v10  ;;  %v3184_v10 = vld [vmem:[#allocation2 + $0x308] sm:$0xff]  }
  0x52   :  { %2807 = vmatpush3.bf16.msra.mxu1 %v3145_v11  ;;  %2814 = vmatprep.subr.bf16.mxu0 %v3146_v24  ;;  %v3185_v11 = vld [vmem:[#allocation2 + $0x388] sm:$0xff]  }
  0x53   :  { %2836 = vmatprep.subr.bf16.mxu1 %v3147_v25  ;;  %v3198_v24 = vld [vmem:[#allocation2 + $0x368] sm:$0xff]  }
  0x54   :  { %1777 = vmatmul.mubr.bf16.vlgmr.msra.gmra.mrb[4].mxu0 %v99_v21  ;;  %v3195_v21 = vld [vmem:[#allocation2 + $0x3e0] sm:$0xff]   ;;  %v3199_v25 = vld [vmem:[#allocation2 + $0x3e8] sm:$0xff]  }
  0x55   :  { %1818 = vmatmul.mubr.bf16.vlgmr.msra.gmra.mrb[4].mxu1 %v101_v23  ;;  %2815 = vmatpush3.bf16.msra.mxu0 %v3148_v26  ;;  %v3197_v23 = vld [vmem:[#allocation2 + $0x3a0] sm:$0xff]   ;;  %v3200_v26 = vld [vmem:[#allocation2 + $0x328] sm:$0xff]  }
  0x56   :  { %2837 = vmatpush3.bf16.msra.mxu1 %v3149_v27  ;;  %2816 = vmatprep.subr.bf16.mxu0 %v3150_v28  ;;  %v3201_v27 = vld [vmem:[#allocation2 + $0x3a8] sm:$0xff]   ;;  %v3202_v28 = vld [vmem:[#allocation2 + $0x370] sm:$0xff]  }
  0x57   :  { %2838 = vmatprep.subr.bf16.mxu1 %v3151_v29  ;;  %1858 = vmatprep.mubr.bf16.mxu0 %v104_v58  ;;  %v3203_v29 = vld [vmem:[#allocation2 + $0x3f0] sm:$0xff]  }
  0x58   :  { %1899 = vmatprep.mubr.bf16.mxu1 %v106_v62  ;;  %v3220_v58 = vld [vmem:[#allocation2 + $0x410] sm:$0xff]   ;;  %v3224_v62 = vld [vmem:[#allocation2 + $0x418] sm:$0xff]  }
  0x59   :  { %2817 = vmatpush3.bf16.msra.mxu0 %v3152_v30  ;;  %v3204_v30 = vld [vmem:[#allocation2 + $0x330] sm:$0xff]  }
  0x5a   :  { %2839 = vmatpush3.bf16.msra.mxu1 %v3153_v31  ;;  %2818 = vmatprep.subr.bf16.mxu0 %v3154_v32  ;;  %v3205_v31 = vld [vmem:[#allocation2 + $0x3b0] sm:$0xff]   ;;  %v3206_v32 = vld [vmem:[#allocation2 + $0x378] sm:$0xff]  }
  0x5b   :  { %2840 = vmatprep.subr.bf16.mxu1 %v3155_v33  ;;  %v3207_v33 = vld [vmem:[#allocation2 + $0x3f8] sm:$0xff]  }
  0x5d   :  { %2819 = vmatpush3.bf16.msra.mxu0 %v3156_v34  ;;  %v3208_v34 = vld [vmem:[#allocation2 + $0x338] sm:$0xff]  }
  0x5e   :  { %2841 = vmatpush3.bf16.msra.mxu1 %v3157_v35  ;;  %2820 = vmatprep.subr.bf16.mxu0 %v3158_v36  ;;  %v3209_v35 = vld [vmem:[#allocation2 + $0x3b8] sm:$0xff]   ;;  %v60_v36 = vld [vmem:[%s3653_s0 + $0x68] sm:$0xff] }
  0x5f   :  { %2842 = vmatprep.subr.bf16.mxu1 %v3159_v37  ;;  %v84_v37 = vld [vmem:[%s3653_s0 + $0x128] sm:$0xff] }
  0x61   :  { %2821 = vmatpush3.bf16.msra.mxu0 %v3160_v38  ;;  %v62_v38 = vld [vmem:[%s3653_s0 + $0x78] sm:$0xff] }
  0x62   :  { %2843 = vmatpush3.bf16.msra.mxu1 %v3161_v39  ;;  %2822 = vmatprep.subr.bf16.mxu0 %v3162_v40  ;;  %v108_v39 = vpack.c.bf16 %v84_v37, %v60_v36  ;;  %v86_v40 = vld [vmem:[%s3653_s0 + $0x138] sm:$0xff]  ;;  %v3250_v36 = vld [vmem:[#allocation2 + $0x550] sm:$0xff]  }
  0x63   :  { %2844 = vmatprep.subr.bf16.mxu1 %v3163_v41  ;;  %v59_v41 = vld [vmem:[%s3653_s0 + $0x60] sm:$0xff]  ;;  %v3251_v37 = vld [vmem:[#allocation2 + $0x5d0] sm:$0xff]  }
  0x65   :  { %2823 = vmatpush3.bf16.msra.mxu0 %v3164_v42  ;;  %v83_v42 = vld [vmem:[%s3653_s0 + $0x120] sm:$0xff] }
  0x66   :  { %2845 = vmatpush3.bf16.msra.mxu1 %v3165_v43  ;;  %2824 = vmatprep.subr.bf16.mxu0 %v3166_v44  ;;  %v110_v43 = vpack.c.bf16 %v86_v40, %v62_v38  ;;  %v107_v44 = vpack.c.bf16 %v83_v42, %v59_v41  ;;  %v3252_v38 = vld [vmem:[#allocation2 + $0x510] sm:$0xff]   ;;  %v3254_v40 = vld [vmem:[#allocation2 + $0x558] sm:$0xff]  }
  0x67   :  { %2846 = vmatprep.subr.bf16.mxu1 %v3167_v45  ;;  %v61_v45 = vld [vmem:[%s3653_s0 + $0x70] sm:$0xff]  ;;  %v3255_v41 = vld [vmem:[#allocation2 + $0x5d8] sm:$0xff]  }
  0x68   :  { %v3256_v42 = vld [vmem:[#allocation2 + $0x518] sm:$0xff]  }
  0x69   :  { %2825 = vmatpush3.bf16.msra.mxu0 %v3168_v46  ;;  %v85_v46 = vld [vmem:[%s3653_s0 + $0x130] sm:$0xff] }
  0x6a   :  { %2847 = vmatpush3.bf16.msra.mxu1 %v3169_v47  ;;  %2826 = vmatprep.subr.bf16.mxu0 %v3170_v48  ;;  %v109_v47 = vpack.c.bf16 %v85_v46, %v61_v45  ;;  %v3210_v48 = vld [vmem:[#allocation2 + $0x440] sm:$0xff]  }
  0x6b   :  { %2848 = vmatprep.subr.bf16.mxu1 %v3171_v49  ;;  %v3211_v49 = vld [vmem:[#allocation2 + $0x4c0] sm:$0xff]  }
  0x6c   :  { %v3259_v45 = vld [vmem:[#allocation2 + $0x5e0] sm:$0xff]  }
  0x6d   :  { %2827 = vmatpush3.bf16.msra.mxu0 %v3172_v50  ;;  %v3212_v50 = vld [vmem:[#allocation2 + $0x400] sm:$0xff]  }
  0x6e   :  { %2849 = vmatpush3.bf16.msra.mxu1 %v3173_v51  ;;  %2828 = vmatprep.subr.bf16.mxu0 %v3174_v52  ;;  %v3213_v51 = vld [vmem:[#allocation2 + $0x480] sm:$0xff]   ;;  %v3214_v52 = vld [vmem:[#allocation2 + $0x448] sm:$0xff]  }
  0x6f   :  { %2850 = vmatprep.subr.bf16.mxu1 %v3175_v53  ;;  %v3215_v53 = vld [vmem:[#allocation2 + $0x4c8] sm:$0xff]   ;;  %v3260_v46 = vld [vmem:[#allocation2 + $0x520] sm:$0xff]  }
  0x71   :  { %2829 = vmatpush3.bf16.msra.mxu0 %v3176_v54  ;;  %v3216_v54 = vld [vmem:[#allocation2 + $0x408] sm:$0xff]  }
  0x72   :  { %2851 = vmatpush3.bf16.msra.mxu1 %v3177_v55  ;;  %2858 = vmatprep.subr.bf16.mxu0 %v3178_v4  ;;  %v3217_v55 = vld [vmem:[#allocation2 + $0x488] sm:$0xff]  }
  0x73   :  { %2880 = vmatprep.subr.bf16.mxu1 %v3179_v5  ;;  %v3230_v4 = vld [vmem:[#allocation2 + $0x468] sm:$0xff]  }
  0x74   :  { %1859 = vmatmul.mubr.bf16.vlgmr.msra.gmra.mrb[8].mxu0 %v103_v2  ;;  %v3228_v2 = vld [vmem:[#allocation2 + $0x420] sm:$0xff]   ;;  %v3231_v5 = vld [vmem:[#allocation2 + $0x4e8] sm:$0xff]  }
  0x75   :  { %1900 = vmatmul.mubr.bf16.vlgmr.msra.gmra.mrb[8].mxu1 %v105_v3  ;;  %2859 = vmatpush3.bf16.msra.mxu0 %v3180_v6  ;;  %v3229_v3 = vld [vmem:[#allocation2 + $0x4a0] sm:$0xff]   ;;  %v3232_v6 = vld [vmem:[#allocation2 + $0x428] sm:$0xff]  }
  0x76   :  { %2881 = vmatpush3.bf16.msra.mxu1 %v3181_v7  ;;  %2860 = vmatprep.subr.bf16.mxu0 %v3182_v8  ;;  %v3233_v7 = vld [vmem:[#allocation2 + $0x4a8] sm:$0xff]   ;;  %v3234_v8 = vld [vmem:[#allocation2 + $0x470] sm:$0xff]  }
  0x77   :  { %2882 = vmatprep.subr.bf16.mxu1 %v3183_v9  ;;  %1940 = vmatprep.mubr.bf16.mxu0 %v108_v39  ;;  %v3235_v9 = vld [vmem:[#allocation2 + $0x4f0] sm:$0xff]  }
  0x78   :  { %1981 = vmatprep.mubr.bf16.mxu1 %v110_v43  ;;  %v3253_v39 = vld [vmem:[#allocation2 + $0x590] sm:$0xff]   ;;  %v3257_v43 = vld [vmem:[#allocation2 + $0x598] sm:$0xff]  }
  0x79   :  { %2861 = vmatpush3.bf16.msra.mxu0 %v3184_v10  ;;  %v3236_v10 = vld [vmem:[#allocation2 + $0x430] sm:$0xff]  }
  0x7a   :  { %2883 = vmatpush3.bf16.msra.mxu1 %v3185_v11  ;;  %2862 = vmatprep.subr.bf16.mxu0 %v3186_v12  ;;  %v3237_v11 = vld [vmem:[#allocation2 + $0x4b0] sm:$0xff]   ;;  %v3238_v12 = vld [vmem:[#allocation2 + $0x478] sm:$0xff]  }
  0x7b   :  { %2884 = vmatprep.subr.bf16.mxu1 %v3187_v13  ;;  %v3239_v13 = vld [vmem:[#allocation2 + $0x4f8] sm:$0xff]  }
  0x7d   :  { %2863 = vmatpush3.bf16.msra.mxu0 %v3188_v14  ;;  %v3240_v14 = vld [vmem:[#allocation2 + $0x438] sm:$0xff]  }
  0x7e   :  { %2885 = vmatpush3.bf16.msra.mxu1 %v3189_v15  ;;  %2864 = vmatprep.subr.bf16.mxu0 %v3190_v16  ;;  %v3241_v15 = vld [vmem:[#allocation2 + $0x4b8] sm:$0xff]   ;;  %v64_v16 = vld [vmem:[%s3653_s0 + $0x88] sm:$0xff] }
  0x7f   :  { %2886 = vmatprep.subr.bf16.mxu1 %v3191_v17  ;;  %v88_v17 = vld [vmem:[%s3653_s0 + $0x148] sm:$0xff] }
  0x81   :  { %2865 = vmatpush3.bf16.msra.mxu0 %v3192_v18  ;;  %v66_v18 = vld [vmem:[%s3653_s0 + $0x98] sm:$0xff] }
  0x82   :  { %2887 = vmatpush3.bf16.msra.mxu1 %v3193_v19  ;;  %2866 = vmatprep.subr.bf16.mxu0 %v3194_v20  ;;  %v90_v19 = vld [vmem:[%s3653_s0 + $0x158] sm:$0xff]  ;;  %v112_v20 = vpack.c.bf16 %v88_v17, %v64_v16 }
  0x83   :  { %2888 = vmatprep.subr.bf16.mxu1 %v3195_v21  ;;  %v114_v21 = vpack.c.bf16 %v90_v19, %v66_v18 }
  0x85   :  { %2867 = vmatpush3.bf16.msra.mxu0 %v3196_v22  ;;  %v63_v22 = vld [vmem:[%s3653_s0 + $0x80] sm:$0xff] }
  0x86   :  { %2889 = vmatpush3.bf16.msra.mxu1 %v3197_v23  ;;  %2868 = vmatprep.subr.bf16.mxu0 %v3198_v24  ;;  %v87_v23 = vld [vmem:[%s3653_s0 + $0x140] sm:$0xff]  ;;  %v65_v24 = vld [vmem:[%s3653_s0 + $0x90] sm:$0xff] }
  0x87   :  { %2890 = vmatprep.subr.bf16.mxu1 %v3199_v25  ;;  %v111_v25 = vpack.c.bf16 %v87_v23, %v63_v22 }
  0x89   :  { %2869 = vmatpush3.bf16.msra.mxu0 %v3200_v26  ;;  %v89_v26 = vld [vmem:[%s3653_s0 + $0x150] sm:$0xff] }
  0x8a   :  { %2891 = vmatpush3.bf16.msra.mxu1 %v3201_v27  ;;  %2870 = vmatprep.subr.bf16.mxu0 %v3202_v28  ;;  %v113_v27 = vpack.c.bf16 %v89_v26, %v65_v24  ;;  %v3242_v28 = vld [vmem:[#allocation2 + $0x540] sm:$0xff]   ;;  %v3325_v26 = vmov 0.0  }
  0x8b   :  { %2892 = vmatprep.subr.bf16.mxu1 %v3203_v29  ;;  %v3243_v29 = vld [vmem:[#allocation2 + $0x5c0] sm:$0xff]  }
  0x8d   :  { %2871 = vmatpush3.bf16.msra.mxu0 %v3204_v30  ;;  %v3244_v30 = vld [vmem:[#allocation2 + $0x500] sm:$0xff]  }
  0x8e   :  { %2893 = vmatpush3.bf16.msra.mxu1 %v3205_v31  ;;  %2872 = vmatprep.subr.bf16.mxu0 %v3206_v32  ;;  %v3245_v31 = vld [vmem:[#allocation2 + $0x580] sm:$0xff]   ;;  %v3246_v32 = vld [vmem:[#allocation2 + $0x548] sm:$0xff]  }
  0x8f   :  { %2894 = vmatprep.subr.bf16.mxu1 %v3207_v33  ;;  %v3247_v33 = vld [vmem:[#allocation2 + $0x5c8] sm:$0xff]  }
  0x91   :  { %2873 = vmatpush3.bf16.msra.mxu0 %v3208_v34  ;;  %v3248_v34 = vld [vmem:[#allocation2 + $0x508] sm:$0xff]  }
  0x92   :  { %2895 = vmatpush3.bf16.msra.mxu1 %v3209_v35  ;;  %2902 = vmatprep.subr.bf16.mxu0 %v3210_v48  ;;  %v3249_v35 = vld [vmem:[#allocation2 + $0x588] sm:$0xff]  }
  0x93   :  { %2924 = vmatprep.subr.bf16.mxu1 %v3211_v49  ;;  %v3262_v48 = vld [vmem:[#allocation2 + $0x568] sm:$0xff]  }
  0x94   :  { %1941 = vmatmul.mubr.bf16.vlgmr.msra.gmra.mrb[12].mxu0 %v107_v44  ;;  %v3258_v44 = vld [vmem:[#allocation2 + $0x560] sm:$0xff]   ;;  %v3263_v49 = vld [vmem:[#allocation2 + $0x5e8] sm:$0xff]  }
  0x95   :  { %1982 = vmatmul.mubr.bf16.vlgmr.msra.gmra.mrb[12].mxu1 %v109_v47  ;;  %2903 = vmatpush3.bf16.msra.mxu0 %v3212_v50  ;;  %v3261_v47 = vld [vmem:[#allocation2 + $0x5a0] sm:$0xff]   ;;  %v3264_v50 = vld [vmem:[#allocation2 + $0x528] sm:$0xff]  }
  0x96   :  { %2925 = vmatpush3.bf16.msra.mxu1 %v3213_v51  ;;  %2904 = vmatprep.subr.bf16.mxu0 %v3214_v52  ;;  %v3265_v51 = vld [vmem:[#allocation2 + $0x5a8] sm:$0xff]   ;;  %v3266_v52 = vld [vmem:[#allocation2 + $0x570] sm:$0xff]  }
  0x97   :  { %2926 = vmatprep.subr.bf16.mxu1 %v3215_v53  ;;  %2022 = vmatprep.mubr.bf16.mxu0 %v112_v20  ;;  %v3267_v53 = vld [vmem:[#allocation2 + $0x5f0] sm:$0xff]  }
  0x98   :  { %2063 = vmatprep.mubr.bf16.mxu1 %v114_v21 }
  0x99   :  { %2905 = vmatpush3.bf16.msra.mxu0 %v3216_v54  ;;  %v3268_v54 = vld [vmem:[#allocation2 + $0x530] sm:$0xff]  }
  0x9a   :  { %2927 = vmatpush3.bf16.msra.mxu1 %v3217_v55  ;;  %2906 = vmatprep.subr.bf16.mxu0 %v3218_v56  ;;  %v3269_v55 = vld [vmem:[#allocation2 + $0x5b0] sm:$0xff]   ;;  %v3270_v56 = vld [vmem:[#allocation2 + $0x578] sm:$0xff]  }
  0x9b   :  { %2928 = vmatprep.subr.bf16.mxu1 %v3219_v57  ;;  %v3271_v57 = vld [vmem:[#allocation2 + $0x5f8] sm:$0xff]  }
  0x9d   :  { %2907 = vmatpush3.bf16.msra.mxu0 %v3220_v58  ;;  %v3272_v58 = vld [vmem:[#allocation2 + $0x538] sm:$0xff]  }
  0x9e   :  { %2929 = vmatpush3.bf16.msra.mxu1 %v3221_v59  ;;  %2908 = vmatprep.subr.bf16.mxu0 %v3222_v60  ;;  %v3273_v59 = vld [vmem:[#allocation2 + $0x5b8] sm:$0xff]   ;;  %v68_v60 = vld [vmem:[%s3653_s0 + $0xa8] sm:$0xff] }
  0x9f   :  { %2930 = vmatprep.subr.bf16.mxu1 %v3223_v61  ;;  %v92_v61 = vld [vmem:[%s3653_s0 + $0x168] sm:$0xff] }
  0xa1   :  { %2909 = vmatpush3.bf16.msra.mxu0 %v3224_v62  ;;  %v116_v62 = vpack.c.bf16 %v92_v61, %v68_v60 }
  0xa2   :  { %2931 = vmatpush3.bf16.msra.mxu1 %v3225_v63  ;;  %2910 = vmatprep.subr.bf16.mxu0 %v3226_v0  ;;  %v70_v63 = vld [vmem:[%s3653_s0 + $0xb8] sm:$0xff] }
  0xa3   :  { %2932 = vmatprep.subr.bf16.mxu1 %v3227_v1  ;;  %v94_v0 = vld [vmem:[%s3653_s0 + $0x178] sm:$0xff]  ;;  %v67_v1 = vld [vmem:[%s3653_s0 + $0xa0] sm:$0xff] }
  0xa5   :  { %2911 = vmatpush3.bf16.msra.mxu0 %v3228_v2  ;;  %v118_v2 = vpack.c.bf16 %v94_v0, %v70_v63 }
  0xa6   :  { %2933 = vmatpush3.bf16.msra.mxu1 %v3229_v3  ;;  %2912 = vmatprep.subr.bf16.mxu0 %v3230_v4  ;;  %v91_v3 = vld [vmem:[%s3653_s0 + $0x160] sm:$0xff]  ;;  %v69_v4 = vld [vmem:[%s3653_s0 + $0xb0] sm:$0xff] }
  0xa7   :  { %2934 = vmatprep.subr.bf16.mxu1 %v3231_v5  ;;  %v93_v5 = vld [vmem:[%s3653_s0 + $0x170] sm:$0xff] }
  0xa9   :  { %2913 = vmatpush3.bf16.msra.mxu0 %v3232_v6  ;;  %v115_v6 = vpack.c.bf16 %v91_v3, %v67_v1  ;;  %v3286_v3 = vld [vmem:[%s3658_s5 + $0x20] sm:$0xff]  }
  0xaa   :  { %2935 = vmatpush3.bf16.msra.mxu1 %v3233_v7  ;;  %2914 = vmatprep.subr.bf16.mxu0 %v3234_v8  ;;  %v117_v7 = vpack.c.bf16 %v93_v5, %v69_v4 }
  0xab   :  { %2936 = vmatprep.subr.bf16.mxu1 %v3235_v9 }
  0xad   :  { %2915 = vmatpush3.bf16.msra.mxu0 %v3236_v10  ;;  %v2506_v10 = vld [vmem:[%s3655_s2] ss:$0 sm:$0xff] }
  0xae   :  { %2937 = vmatpush3.bf16.msra.mxu1 %v3237_v11  ;;  %2916 = vmatprep.subr.bf16.mxu0 %v3238_v12 }
  0xaf   :  { %2938 = vmatprep.subr.bf16.mxu1 %v3239_v13 }
  0xb1   :  { %2917 = vmatpush3.bf16.msra.mxu0 %v3240_v14 }
  0xb2   :  { %2939 = vmatpush3.bf16.msra.mxu1 %v3241_v15  ;;  %2946 = vmatprep.subr.bf16.mxu0 %v3242_v28  ;;  %v3276_v28 = vld [vmem:[%s3656_s3 + $0x10] sm:$0xff]  }
  0xb3   :  { %2968 = vmatprep.subr.bf16.mxu1 %v3243_v29  ;;  %v3277_v29 = vld [vmem:[%s3656_s3 + $0x18] sm:$0xff]  }
  0xb4   :  { %2023 = vmatmul.mubr.bf16.vlgmr.msra.gmra.mrb[16].mxu0 %v111_v25  ;;  %v3274_v25 = vld [vmem:[%s3656_s3] sm:$0xff]  }
  0xb5   :  { %2064 = vmatmul.mubr.bf16.vlgmr.msra.gmra.mrb[16].mxu1 %v113_v27  ;;  %2947 = vmatpush3.bf16.msra.mxu0 %v3244_v30  ;;  %v3275_v27 = vld [vmem:[%s3656_s3 + $0x8] sm:$0xff]   ;;  %v3278_v30 = vld [vmem:[%s3656_s3 + $0x20] sm:$0xff]  }
  0xb6   :  { %2969 = vmatpush3.bf16.msra.mxu1 %v3245_v31  ;;  %2948 = vmatprep.subr.bf16.mxu0 %v3246_v32 }
  0xb7   :  { %2970 = vmatprep.subr.bf16.mxu1 %v3247_v33  ;;  %2104 = vmatprep.mubr.bf16.mxu0 %v116_v62 }
  0xb8   :  { %2145 = vmatprep.mubr.bf16.mxu1 %v118_v2 }
  0xb9   :  { %2949 = vmatpush3.bf16.msra.mxu0 %v3248_v34 }
  0xba   :  { %2971 = vmatpush3.bf16.msra.mxu1 %v3249_v35  ;;  %2950 = vmatprep.subr.bf16.mxu0 %v3250_v36 }
  0xbb   :  { %2972 = vmatprep.subr.bf16.mxu1 %v3251_v37 }
  0xbd   :  { %2951 = vmatpush3.bf16.msra.mxu0 %v3252_v38 }
  0xbe   :  { %2973 = vmatpush3.bf16.msra.mxu1 %v3253_v39  ;;  %2952 = vmatprep.subr.bf16.mxu0 %v3254_v40 }
  0xbf   :  { %2974 = vmatprep.subr.bf16.mxu1 %v3255_v41 }
  0xc1   :  { %2953 = vmatpush3.bf16.msra.mxu0 %v3256_v42 }
  0xc2   :  { %2975 = vmatpush3.bf16.msra.mxu1 %v3257_v43  ;;  %2954 = vmatprep.subr.bf16.mxu0 %v3258_v44 }
  0xc3   :  { %2976 = vmatprep.subr.bf16.mxu1 %v3259_v45 }
  0xc5   :  { %2955 = vmatpush3.bf16.msra.mxu0 %v3260_v46 }
  0xc6   :  { %2977 = vmatpush3.bf16.msra.mxu1 %v3261_v47  ;;  %2956 = vmatprep.subr.bf16.mxu0 %v3262_v48  ;;  %v3279_v47 = vld [vmem:[%s3656_s3 + $0x28] sm:$0xff]   ;;  %v3280_v48 = vld [vmem:[%s3656_s3 + $0x30] sm:$0xff]  }
  0xc7   :  { %2978 = vmatprep.subr.bf16.mxu1 %v3263_v49  ;;  %v3281_v49 = vld [vmem:[%s3656_s3 + $0x38] sm:$0xff]  }
  0xc9   :  { %2957 = vmatpush3.bf16.msra.mxu0 %v3264_v50  ;;  %v3282_v50 = vld [vmem:[%s3658_s5] sm:$0xff]  }
  0xca   :  { %2979 = vmatpush3.bf16.msra.mxu1 %v3265_v51  ;;  %2958 = vmatprep.subr.bf16.mxu0 %v3266_v52  ;;  %v3283_v51 = vld [vmem:[%s3658_s5 + $0x8] sm:$0xff]   ;;  %v3284_v52 = vld [vmem:[%s3658_s5 + $0x10] sm:$0xff]  }
  0xcb   :  { %2980 = vmatprep.subr.bf16.mxu1 %v3267_v53 }
  0xcd   :  { %2959 = vmatpush3.bf16.msra.mxu0 %v3268_v54 }
  0xce   :  { %2981 = vmatpush3.bf16.msra.mxu1 %v3269_v55  ;;  %2960 = vmatprep.subr.bf16.mxu0 %v3270_v56  ;;  %v3285_v55 = vld [vmem:[%s3658_s5 + $0x18] sm:$0xff]  }
  0xcf   :  { %2982 = vmatprep.subr.bf16.mxu1 %v3271_v57 }
  0xd1   :  { %2961 = vmatpush3.bf16.msra.mxu0 %v3272_v58 }
  0xd2   :  { %2983 = vmatpush3.bf16.msra.mxu1 %v3273_v59  ;;  %3017 = vmatprep.subr.bf16.mxu0 %v3325_v26 }
  0xd3   :  { %3037 = vmatprep.subr.bf16.mxu1 %v3325_v26 }
  0xd4   :  { %2105 = vmatmul.mubr.bf16.vlgmr.msra.gmra.mrb[20].mxu0 %v115_v6 }
  0xd5   :  { %2146 = vmatmul.mubr.bf16.vlgmr.msra.gmra.mrb[20].mxu1 %v117_v7  ;;  %3018 = vmatpush3.bf16.msra.mxu0 %v3274_v25  ;;  %v3287_v7 = vld [vmem:[%s3658_s5 + $0x28] sm:$0xff]  }
  0xd6   :  { %3019 = vmatprep.subr.bf16.mxu0 %v3325_v26  ;;  %3033 = vmatprep.mubr.msk.bf16.mxu0 %vm3326_vm0, %v3325_v26 }
  0xd7   :  { %3053 = vmatprep.mubr.msk.bf16.mxu1 %vm3326_vm0, %v3325_v26  ;;  %3038 = vmatpush3.bf16.msra.mxu1 %v3282_v50 }
  0xd8   :  { %3039 = vmatprep.subr.bf16.mxu1 %v3325_v26 }
  0xd9   :  { %3020 = vmatpush3.bf16.msra.mxu0 %v3275_v27 }
  0xda   :  { %3021 = vmatprep.subr.bf16.mxu0 %v3325_v26 }
  0xdb   :  { %3040 = vmatpush3.bf16.msra.mxu1 %v3283_v51 }
  0xdc   :  { %3041 = vmatprep.subr.bf16.mxu1 %v3325_v26 }
  0xdd   :  { %3022 = vmatpush3.bf16.msra.mxu0 %v3276_v28 }
  0xde   :  { %3023 = vmatprep.subr.bf16.mxu0 %v3325_v26 }
  0xdf   :  { %3042 = vmatpush3.bf16.msra.mxu1 %v3284_v52 }
  0xe0   :  { %3043 = vmatprep.subr.bf16.mxu1 %v3325_v26 }
  0xe1   :  { %3024 = vmatpush3.bf16.msra.mxu0 %v3277_v29 }
  0xe2   :  { %3025 = vmatprep.subr.bf16.mxu0 %v3325_v26 }
  0xe3   :  { %3044 = vmatpush3.bf16.msra.mxu1 %v3285_v55 }
  0xe4   :  { %3045 = vmatprep.subr.bf16.mxu1 %v3325_v26 }
  0xe5   :  { %3026 = vmatpush3.bf16.msra.mxu0 %v3278_v30 }
  0xe6   :  { %3027 = vmatprep.subr.bf16.mxu0 %v3325_v26 }
  0xe7   :  { %3046 = vmatpush3.bf16.msra.mxu1 %v3286_v3  ;;  %v3295_v3 = vld [vmem:[%s3660_s7 + $0x28] sm:$0xff]  }
  0xe8   :  { %3047 = vmatprep.subr.bf16.mxu1 %v3325_v26 }
  0xe9   :  { %3028 = vmatpush3.bf16.msra.mxu0 %v3279_v47 }
  0xea   :  { %3029 = vmatprep.subr.bf16.mxu0 %v3325_v26 }
  0xeb   :  { %3048 = vmatpush3.bf16.msra.mxu1 %v3287_v7 }
  0xec   :  { %3049 = vmatprep.subr.bf16.mxu1 %v3325_v26 }
  0xed   :  { %3030 = vmatpush3.bf16.msra.mxu0 %v3280_v48 }
  0xee   :  { %3031 = vmatprep.subr.bf16.mxu0 %v3325_v26 }
  0xf1   :  { %3032 = vmatpush3.bf16.msra.mxu0 %v3281_v49 }
  0xf2   :  { %3057 = vmatprep.subr.bf16.mxu0 %v3325_v26 }
 0x107   :  { %v2742_v8 = vpop.f32.mrb[0].mxu0 }
 0x108   :  { %v2764_v9 = vpop.f32.mrb[0].mxu1  ;;  %v2743_v11 = vpop.f32.mrb[1].mxu0 }
 0x109   :  { %v2744_v12 = vadd.f32 %v2743_v11, %v2742_v8  ;;  %v2765_v13 = vpop.f32.mrb[1].mxu1  ;;  %v2745_v14 = vpop.f32.mrb[2].mxu0 }
 0x10a   :  { %v2766_v15 = vadd.f32 %v2765_v13, %v2764_v9  ;;  %v2767_v16 = vpop.f32.mrb[2].mxu1  ;;  %v2746_v17 = vpop.f32.mrb[3].mxu0 }
 0x10b   :  { %v1697_v18 = vadd.f32 %v2744_v12, %v2506_v10  ;;  %v2747_v19 = vadd.f32 %v2746_v17, %v2745_v14  ;;  %v2768_v20 = vpop.f32.mrb[3].mxu1 }
 0x10c   :  { %v2769_v21 = vadd.f32 %v2768_v20, %v2767_v16 }
 0x10d   :  { %v1738_v22 = vadd.f32 %v2766_v15, %v1697_v18  ;;  %v1700_v23 = vadd.f32 %v2747_v19, %v2506_v10 }
 0x10f   :  { %v1741_v24 = vadd.f32 %v2769_v21, %v1700_v23 }
 0x127   :  { %v2786_v31 = vpop.f32.mrb[4].mxu0 }
 0x128   :  { %v2808_v32 = vpop.f32.mrb[4].mxu1  ;;  %v2787_v33 = vpop.f32.mrb[5].mxu0 }
 0x129   :  { %v2788_v34 = vadd.f32 %v2787_v33, %v2786_v31  ;;  %v2809_v35 = vpop.f32.mrb[5].mxu1  ;;  %v2789_v36 = vpop.f32.mrb[6].mxu0 }
 0x12a   :  { %v2810_v37 = vadd.f32 %v2809_v35, %v2808_v32  ;;  %v2811_v38 = vpop.f32.mrb[6].mxu1  ;;  %v2790_v39 = vpop.f32.mrb[7].mxu0 }
 0x12b   :  { %v1779_v40 = vadd.f32 %v2788_v34, %v1738_v22  ;;  %v2791_v41 = vadd.f32 %v2790_v39, %v2789_v36  ;;  %v2812_v42 = vpop.f32.mrb[7].mxu1 }
 0x12c   :  { %v2813_v43 = vadd.f32 %v2812_v42, %v2811_v38 }
 0x12d   :  { %v1820_v44 = vadd.f32 %v2810_v37, %v1779_v40  ;;  %v1782_v45 = vadd.f32 %v2791_v41, %v1741_v24 }
 0x12f   :  { %v1823_v46 = vadd.f32 %v2813_v43, %v1782_v45 }
 0x147   :  { %v2830_v53 = vpop.f32.mrb[8].mxu0 }
 0x148   :  { %v2852_v54 = vpop.f32.mrb[8].mxu1  ;;  %v2831_v56 = vpop.f32.mrb[9].mxu0 }
 0x149   :  { %v2853_v57 = vpop.f32.mrb[9].mxu1  ;;  %v2832_v58 = vadd.f32 %v2831_v56, %v2830_v53  ;;  %v2833_v60 = vpop.f32.mrb[10].mxu0 }
 0x14a   :  { %v2854_v59 = vadd.f32 %v2853_v57, %v2852_v54  ;;  %v2855_v61 = vpop.f32.mrb[10].mxu1  ;;  %v2834_v62 = vpop.f32.mrb[11].mxu0 }
 0x14b   :  { %v2856_v63 = vpop.f32.mrb[11].mxu1  ;;  %v1861_v0 = vadd.f32 %v2832_v58, %v1820_v44  ;;  %v2835_v1 = vadd.f32 %v2834_v62, %v2833_v60  ;;  %v3288_v60 = vld [vmem:[%s3658_s5 + $0x30] sm:$0xff]   ;;  %v3290_v62 = vld [vmem:[%s3660_s7] sm:$0xff]  }
 0x14c   :  { %v2857_v2 = vadd.f32 %v2856_v63, %v2855_v61  ;;  %3050 = vmatpush3.bf16.msra.mxu1 %v3288_v60  ;;  %v3289_v61 = vld [vmem:[%s3658_s5 + $0x38] sm:$0xff]   ;;  %v3291_v63 = vld [vmem:[%s3660_s7 + $0x8] sm:$0xff]  }
 0x14d   :  { %v1902_v4 = vadd.f32 %v2854_v59, %v1861_v0  ;;  %v1864_v5 = vadd.f32 %v2835_v1, %v1823_v46  ;;  %3051 = vmatprep.subr.bf16.mxu1 %v3325_v26  ;;  %v3292_v0 = vld [vmem:[%s3660_s7 + $0x10] sm:$0xff]   ;;  %v3293_v1 = vld [vmem:[%s3660_s7 + $0x18] sm:$0xff]  }
 0x14f   :  { %v1905_v6 = vadd.f32 %v2857_v2, %v1864_v5  ;;  %v3294_v2 = vld [vmem:[%s3660_s7 + $0x20] sm:$0xff]  }
 0x150   :  { %3052 = vmatpush3.bf16.msra.mxu1 %v3289_v61 }
 0x167   :  { %v2874_v8 = vpop.f32.mrb[12].mxu0 }
 0x168   :  { %v2896_v9 = vpop.f32.mrb[12].mxu1  ;;  %v2875_v10 = vpop.f32.mrb[13].mxu0 }
 0x169   :  { %v2876_v11 = vadd.f32 %v2875_v10, %v2874_v8  ;;  %v2897_v12 = vpop.f32.mrb[13].mxu1  ;;  %v2877_v13 = vpop.f32.mrb[14].mxu0 }
 0x16a   :  { %v2898_v14 = vadd.f32 %v2897_v12, %v2896_v9  ;;  %v2899_v15 = vpop.f32.mrb[14].mxu1  ;;  %v2878_v16 = vpop.f32.mrb[15].mxu0 }
 0x16b   :  { %v1943_v17 = vadd.f32 %v2876_v11, %v1902_v4  ;;  %v2879_v18 = vadd.f32 %v2878_v16, %v2877_v13  ;;  %v2900_v19 = vpop.f32.mrb[15].mxu1  ;;  %v2699_v4 = vld [vmem:[%s3657_s4] ss:$0 sm:$0xff] }
 0x16c   :  { %v2901_v20 = vadd.f32 %v2900_v19, %v2899_v15  ;;  %v3297_v15 = vld [vmem:[%s3660_s7 + $0x38] sm:$0xff]   ;;  %v2708_v16 = vld [vmem:[%s3659_s6] ss:$0 sm:$0xff] }
 0x16d   :  { %v1984_v21 = vadd.f32 %v2898_v14, %v1943_v17  ;;  %v1946_v22 = vadd.f32 %v2879_v18, %v1905_v6  ;;  %v3296_v14 = vld [vmem:[%s3660_s7 + $0x30] sm:$0xff]  }
 0x16f   :  { %v1987_v23 = vadd.f32 %v2901_v20, %v1946_v22 }
 0x187   :  { %v2918_v24 = vpop.f32.mrb[16].mxu0 }
 0x188   :  { %v2940_v25 = vpop.f32.mrb[16].mxu1  ;;  %v2919_v27 = vpop.f32.mrb[17].mxu0 }
 0x189   :  { %v2920_v28 = vadd.f32 %v2919_v27, %v2918_v24  ;;  %v2941_v29 = vpop.f32.mrb[17].mxu1  ;;  %v2921_v30 = vpop.f32.mrb[18].mxu0 }
 0x18a   :  { %v2942_v31 = vadd.f32 %v2941_v29, %v2940_v25  ;;  %v2943_v32 = vpop.f32.mrb[18].mxu1  ;;  %v2922_v33 = vpop.f32.mrb[19].mxu0 }
 0x18b   :  { %v2025_v34 = vadd.f32 %v2920_v28, %v1984_v21  ;;  %v2923_v35 = vadd.f32 %v2922_v33, %v2921_v30  ;;  %v2944_v36 = vpop.f32.mrb[19].mxu1 }
 0x18c   :  { %v2945_v37 = vadd.f32 %v2944_v36, %v2943_v32 }
 0x18d   :  { %v2066_v38 = vadd.f32 %v2942_v31, %v2025_v34  ;;  %v2028_v39 = vadd.f32 %v2923_v35, %v1987_v23 }
 0x18f   :  { %v2069_v40 = vadd.f32 %v2945_v37, %v2028_v39 }
 0x1a7   :  { %v2962_v41 = vpop.f32.mrb[20].mxu0 }
 0x1a8   :  { %v2984_v42 = vpop.f32.mrb[20].mxu1  ;;  %v2963_v43 = vpop.f32.mrb[21].mxu0 }
 0x1a9   :  { %v2985_v44 = vpop.f32.mrb[21].mxu1  ;;  %v2964_v45 = vadd.f32 %v2963_v43, %v2962_v41  ;;  %v2965_v47 = vpop.f32.mrb[22].mxu0 }
 0x1aa   :  { %v2986_v46 = vadd.f32 %v2985_v44, %v2984_v42  ;;  %v2987_v48 = vpop.f32.mrb[22].mxu1  ;;  %v2966_v49 = vpop.f32.mrb[23].mxu0 }
 0x1ab   :  { %v2988_v50 = vpop.f32.mrb[23].mxu1  ;;  %v2107_v51 = vadd.f32 %v2964_v45, %v2066_v38  ;;  %v2967_v52 = vadd.f32 %v2966_v49, %v2965_v47 }
 0x1ac   :  { %v2989_v53 = vadd.f32 %v2988_v50, %v2987_v48 }
 0x1ad   :  { %v2148_v54 = vadd.f32 %v2986_v46, %v2107_v51  ;;  %v2110_v55 = vadd.f32 %v2967_v52, %v2069_v40 }
 0x1af   :  { %v2151_v56 = vadd.f32 %v2989_v53, %v2110_v55  ;;  %v2154_v57 = vmax.f32 %v2148_v54, 0.0 }
 0x1b1   :  { %v2155_v58 = vmax.f32 %v2151_v56, 0.0 }
 0x1b3   :  { %v2156_v59 = vpack.c.bf16 %v2155_v58, %v2154_v57 }
 0x1b5   :  { %3034 = vmatmul.mubr.bf16.vlgmr.msra.gmra.mrb[24].mxu0 %v2156_v59 }
 0x1b6   :  { %3073 = vmatprep.mubr.msk.bf16.mxu0 %vm3326_vm0, %v3325_v26  ;;  %3058 = vmatpush3.bf16.msra.mxu0 %v3290_v62 }
 0x1b7   :  { %3059 = vmatprep.subr.bf16.mxu0 %v3325_v26 }
 0x1ba   :  { %3060 = vmatpush3.bf16.msra.mxu0 %v3291_v63 }
 0x1bb   :  { %3061 = vmatprep.subr.bf16.mxu0 %v3325_v26 }
 0x1be   :  { %3062 = vmatpush3.bf16.msra.mxu0 %v3292_v0 }
 0x1bf   :  { %3063 = vmatprep.subr.bf16.mxu0 %v3325_v26 }
 0x1c2   :  { %3064 = vmatpush3.bf16.msra.mxu0 %v3293_v1 }
 0x1c3   :  { %3065 = vmatprep.subr.bf16.mxu0 %v3325_v26 }
 0x1c6   :  { %3066 = vmatpush3.bf16.msra.mxu0 %v3294_v2 }
 0x1c7   :  { %3067 = vmatprep.subr.bf16.mxu0 %v3325_v26 }
 0x1ca   :  { %3068 = vmatpush3.bf16.msra.mxu0 %v3295_v3 }
 0x1cb   :  { %3069 = vmatprep.subr.bf16.mxu0 %v3325_v26 }
 0x1ce   :  { %3070 = vmatpush3.bf16.msra.mxu0 %v3296_v14 }
 0x1cf   :  { %3071 = vmatprep.subr.bf16.mxu0 %v3325_v26  ;;  %v2717_v26 = vld [vmem:[%s3661_s8] ss:$0 sm:$0xff] }
 0x1d2   :  { %3072 = vmatpush3.bf16.msra.mxu0 %v3297_v15 }
 0x288   :  { %v2262_v5 = vpop.f32.mrb[24].mxu0 }
 0x289   :  { %v2263_v6 = vadd.f32 %v2699_v4, %v2262_v5  ;;  %v3035_v7 = vpop.f32.mrb[25].mxu0 }
 0x28a   :  { %v2265_v8 = vpop.f32.mrb[26].mxu0 }
 0x28b   :  { %v2266_v9 = vadd.f32 %v2699_v4, %v2265_v8  ;;  %v3036_v10 = vpop.f32.mrb[27].mxu0  ;;  %v2269_v11 = vmax.f32 %v2263_v6, 0.0 }
 0x28d   :  { %v2270_v12 = vmax.f32 %v2266_v9, 0.0 }
 0x28f   :  { %v2271_v13 = vpack.c.bf16 %v2270_v12, %v2269_v11 }
 0x291   :  { %3054 = vmatmul.mubr.bf16.vlgmr.msra.gmra.mrb[24].mxu1 %v2271_v13 }
 0x364   :  { %v2377_v17 = vpop.f32.mrb[24].mxu1 }
 0x365   :  { %v2378_v18 = vadd.f32 %v2708_v16, %v2377_v17  ;;  %v3055_v19 = vpop.f32.mrb[25].mxu1 }
 0x366   :  { %v2380_v20 = vpop.f32.mrb[26].mxu1 }
 0x367   :  { %v2381_v21 = vadd.f32 %v2708_v16, %v2380_v20  ;;  %v3056_v22 = vpop.f32.mrb[27].mxu1  ;;  %v2384_v23 = vmax.f32 %v2378_v18, 0.0 }
 0x369   :  { %v2385_v24 = vmax.f32 %v2381_v21, 0.0 }
 0x36b   :  { %v2386_v25 = vpack.c.bf16 %v2385_v24, %v2384_v23 }
 0x36d   :  { %3074 = vmatmul.mubr.bf16.vlgmr.msra.gmra.mrb[28].mxu0 %v2386_v25 }
 0x440   :  { %v2492_v27 = vpop.f32.mrb[28].mxu0 }
 0x441   :  { %v2493_v28 = vadd.f32 %v2717_v26, %v2492_v27  ;;  %v3075_v29 = vpop.f32.mrb[29].mxu0 }
 0x442   :  { %v2495_v30 = vpop.f32.mrb[30].mxu0 }
 0x443   :  { %2499 = vst [vmem:[%s3662_s9] sm:$0xff] %v2493_v28  ;;  %v2496_v31 = vadd.f32 %v2717_v26, %v2495_v30  ;;  %v3076_v32 = vpop.f32.mrb[31].mxu0 }
 0x445   :  { %2500 = vst [vmem:[%s3662_s9 + $0x8] sm:$0xff] %v2496_v31 }
 0x446   :  { %2505 = vsyncpa [#allocation3], 1 }

</bundles_post_ra>
